<compile_context>
chip_gen: v7x
topology: tpu7x:2x2x1
jax: 0.10.0
libtpu: 0.0.40
codegen_flags: <defaults>
</compile_context>

<pallas_src>
import functools

import jax
import jax.numpy as jnp
from jax.experimental import pallas as pl
from jax.experimental.pallas import tpu as pltpu


_VMEM_WORKING_SET_BUDGET = 40 * 1024 * 1024   # pipelined-input budget (v7x-safe)
_VMEM_LIMIT_CAP = 48 * 1024 * 1024            # leave headroom under v7x 64 MiB


def _complex_kernel_split(e1r_ref, e1i_ref, rr_ref, ri_ref, e2r_ref, e2i_ref,
                          out_ref):
    """Halves pre-split by BlockSpec (half % 128 == 0): six (tb, half) refs."""
    e1_r, e1_i = e1r_ref[...], e1i_ref[...]
    r_r, r_i = rr_ref[...], ri_ref[...]
    e2_r, e2_i = e2r_ref[...], e2i_ref[...]
    # Products in the native input dtype (bf16-native on v6e/v7x); factored form
    # saves VALU ops:  e1_r*(r_r*e2_r + r_i*e2_i) + e1_i*(r_r*e2_i - r_i*e2_r)
    score = e1_r * (r_r * e2_r + r_i * e2_i) + e1_i * (r_r * e2_i - r_i * e2_r)
    # Accumulate the feature reduction in f32; lane-dense (1, tb) store.
    row = jnp.sum(score.astype(jnp.float32), axis=-1)
    out_ref[...] = row[None, :].astype(out_ref.dtype)


def _complex_kernel_fused(e1_ref, r_ref, e2_ref, out_ref, *, half):
    """half not 128-aligned: slice the refs (not loaded+upcast arrays)."""
    e1_r, e1_i = e1_ref[:, :half], e1_ref[:, half:]
    r_r, r_i = r_ref[:, :half], r_ref[:, half:]
    e2_r, e2_i = e2_ref[:, :half], e2_ref[:, half:]
    score = e1_r * (r_r * e2_r + r_i * e2_i) + e1_i * (r_r * e2_i - r_i * e2_r)
    row = jnp.sum(score.astype(jnp.float32), axis=-1)
    out_ref[...] = row[None, :].astype(out_ref.dtype)


def _pick_batch_tile(batch, dim, itemsize):
    """VMEM-budget-, dim-, dtype-aware batch tile (multiple of 8 unless == batch)."""
    bytes_per_row = 6 * dim * itemsize          # 3 inputs x 2 pipeline buffers
    vmem_cap = max(8, (_VMEM_WORKING_SET_BUDGET // bytes_per_row) // 8 * 8)
    if batch <= min(256, vmem_cap):
        return batch                            # small batch: one block
    target = 1024 if batch >= 4096 else 512     # HBM-roofline sweet spot
    depth_cap = max(256, (batch // 4) // 8 * 8)  # >=~4 grid steps (megacore + pipeline)
    return max(8, min(target, depth_cap, vmem_cap))


def _vmem_limit_bytes(tb, dim, itemsize):
    working_set = 6 * tb * dim * itemsize       # pipelined input buffers
    temps = 4 * tb * (dim // 2) * 4             # f32 elementwise temporaries
    return int(min(_VMEM_LIMIT_CAP, max(16 << 20, working_set + temps + (4 << 20))))


def complex_forward(e1, r, e2, *, feat_drop=0.0):
    """ComplEx.forward in eval mode (training=False -> dropout is identity).

    e1, r, e2: (B, dim) with dim even  ->  pred: (B,)
    """
    # TODO(synk): F.dropout with training=True (stochastic) not implemented; eval-mode identity.
    B, dim = e1.shape
    assert dim % 2 == 0
    assert r.shape == (B, dim) and e2.shape == (B, dim)
    half = dim // 2

    itemsize = jnp.dtype(e1.dtype).itemsize
    tb = _pick_batch_tile(B, dim, itemsize)
    num_blocks = pl.cdiv(B, tb)
    grid = (num_blocks,)

    # Lane-dense output slab: one contiguous (1, tb) store per grid step.
    out_shape = jax.ShapeDtypeStruct((num_blocks, tb), e1.dtype)
    out_spec = pl.BlockSpec((1, tb), lambda i: (i, 0))

    cost = pl.CostEstimate(
        flops=5 * B * dim,
        transcendentals=0,
        bytes_accessed=3 * B * dim * itemsize + B * itemsize,
    )
    cparams = pltpu.CompilerParams(
        dimension_semantics=("parallel",),
        vmem_limit_bytes=_vmem_limit_bytes(tb, dim, itemsize),
    )

    if half % 128 == 0:
        # Zero-copy real/imag split via BlockSpec column-block index 0 / 1.
        real_spec = pl.BlockSpec((tb, half), lambda i: (i, 0))
        imag_spec = pl.BlockSpec((tb, half), lambda i: (i, 1))
        out = pl.pallas_call(
            _complex_kernel_split,
            out_shape=out_shape,
            grid_spec=pltpu.PrefetchScalarGridSpec(
                num_scalar_prefetch=0,
                grid=grid,
                in_specs=[real_spec, imag_spec] * 3,   # e1, e1, r, r, e2, e2
                out_specs=out_spec,
            ),
            compiler_params=cparams,
            cost_estimate=cost,
        )(e1, e1, r, r, e2, e2)
    else:
        row_spec = pl.BlockSpec((tb, dim), lambda i: (i, 0))
        out = pl.pallas_call(
            functools.partial(_complex_kernel_fused, half=half),
            out_shape=out_shape,
            grid_spec=pltpu.PrefetchScalarGridSpec(
                num_scalar_prefetch=0,
                grid=grid,
                in_specs=[row_spec, row_spec, row_spec],   # e1, r, e2
                out_specs=out_spec,
            ),
            compiler_params=cparams,
            cost_estimate=cost,
        )(e1, r, e2)

    # Drop the padded tail rows (num_blocks*tb >= B) and flatten to (B,).
    return out.reshape(-1)[:B]


def _complex_reference(e1, r, e2):
    half = e1.shape[1] // 2
    e1_r, e1_i = e1[:, :half], e1[:, half:]
    r_r, r_i = r[:, :half], r[:, half:]
    e2_r, e2_i = e2[:, :half], e2[:, half:]
    score = (e1_r * r_r * e2_r + e1_r * r_i * e2_i
             + e1_i * r_r * e2_i - e1_i * r_i * e2_r)
    return score.sum(axis=1)


if __name__ == "__main__":
    key = jax.random.PRNGKey(0)
    k1, k2, k3, k4, k5, k6 = jax.random.split(key, 6)

    # Test 1: small shapes consistent with the module; half=32 (not 128-aligned)
    # exercises the in-kernel ref-slice path.
    B1, dim1 = 8, 64
    e1 = jax.random.normal(k1, (B1, dim1), dtype=jnp.float32)
    r = jax.random.normal(k2, (B1, dim1), dtype=jnp.float32)
    e2 = jax.random.normal(k3, (B1, dim1), dtype=jnp.float32)

    pred = complex_forward(e1, r, e2, feat_drop=0.1)
    pred = jax.block_until_ready(pred)
    ref = _complex_reference(e1, r, e2)
    assert pred.shape == (B1,)
    assert jnp.allclose(pred, ref, atol=1e-4, rtol=1e-4), (pred, ref)

    # Test 2: 128-aligned halves (BlockSpec split path) with a non-divisible
    # batch -> multi-block grid plus a padded tail block.
    B2, dim2 = 300, 256
    e1b = jax.random.normal(k4, (B2, dim2), dtype=jnp.float32)
    rb = jax.random.normal(k5, (B2, dim2), dtype=jnp.float32)
    e2b = jax.random.normal(k6, (B2, dim2), dtype=jnp.float32)

    predb = complex_forward(e1b, rb, e2b)
    predb = jax.block_until_ready(predb)
    refb = _complex_reference(e1b, rb, e2b)
    assert predb.shape == (B2,)
    assert jnp.allclose(predb, refb, atol=1e-3, rtol=1e-3)

    print("KERNEL_OK")
</pallas_src>

<mosaic_0001>
module attributes {stable_mosaic.version = 11 : i64} {
  func.func @_complex_kernel_fused(%arg0: i32, %arg1: memref<8x64xf32, #tpu.memory_space<vmem>>, %arg2: memref<8x64xf32, #tpu.memory_space<vmem>>, %arg3: memref<8x64xf32, #tpu.memory_space<vmem>>, %arg4: memref<1x8xf32, #tpu.memory_space<vmem>>) attributes {dimension_semantics = [#tpu.dimension_semantics<parallel>], iteration_bounds = array<i64: 1>, scalar_prefetch = 0 : i64, scratch_operands = 0 : i64, tpu.core_type = #tpu.core_type<tc>, window_params = [{transform_indices = @transform_0, window_bounds = array<i64: 8, 64>}, {transform_indices = @transform_1, window_bounds = array<i64: 8, 64>}, {transform_indices = @transform_2, window_bounds = array<i64: 8, 64>}, {transform_indices = @transform_3, window_bounds = array<i64: 1, 8>}]} {
    %c0 = arith.constant 0 : index
    %c0_0 = arith.constant 0 : index
    %0 = vector.load %arg1[%c0, %c0_0] : memref<8x64xf32, #tpu.memory_space<vmem>>, vector<8x32xf32>
    %c0_1 = arith.constant 0 : index
    %c32 = arith.constant 32 : index
    %1 = vector.load %arg1[%c0_1, %c32] : memref<8x64xf32, #tpu.memory_space<vmem>>, vector<8x32xf32>
    %c0_2 = arith.constant 0 : index
    %c0_3 = arith.constant 0 : index
    %2 = vector.load %arg2[%c0_2, %c0_3] : memref<8x64xf32, #tpu.memory_space<vmem>>, vector<8x32xf32>
    %c0_4 = arith.constant 0 : index
    %c32_5 = arith.constant 32 : index
    %3 = vector.load %arg2[%c0_4, %c32_5] : memref<8x64xf32, #tpu.memory_space<vmem>>, vector<8x32xf32>
    %c0_6 = arith.constant 0 : index
    %c0_7 = arith.constant 0 : index
    %4 = vector.load %arg3[%c0_6, %c0_7] : memref<8x64xf32, #tpu.memory_space<vmem>>, vector<8x32xf32>
    %c0_8 = arith.constant 0 : index
    %c32_9 = arith.constant 32 : index
    %5 = vector.load %arg3[%c0_8, %c32_9] : memref<8x64xf32, #tpu.memory_space<vmem>>, vector<8x32xf32>
    %6 = arith.mulf %2, %4 : vector<8x32xf32>
    %7 = arith.mulf %3, %5 : vector<8x32xf32>
    %8 = arith.addf %6, %7 : vector<8x32xf32>
    %9 = arith.mulf %0, %8 : vector<8x32xf32>
    %10 = arith.mulf %2, %5 : vector<8x32xf32>
    %11 = arith.mulf %3, %4 : vector<8x32xf32>
    %12 = arith.subf %10, %11 : vector<8x32xf32>
    %13 = arith.mulf %1, %12 : vector<8x32xf32>
    %14 = arith.addf %9, %13 : vector<8x32xf32>
    %cst = arith.constant dense<0.000000e+00> : vector<8xf32>
    %15 = vector.multi_reduction <add>, %14, %cst [1] : vector<8x32xf32> to vector<8xf32>
    %16 = vector.shape_cast %15 : vector<8xf32> to vector<1x8xf32>
    %c0_10 = arith.constant 0 : index
    %c0_11 = arith.constant 0 : index
    %17 = vector.load %arg4[%c0_10, %c0_11] : memref<1x8xf32, #tpu.memory_space<vmem>>, vector<1x8xf32>
    tpu.vector_store %arg4[%c0_10, %c0_11], %16 {strides = array<i32>} : memref<1x8xf32, #tpu.memory_space<vmem>>, vector<1x8xf32>,
    return
  }
  func.func @transform_0(%arg0: i32) -> (i32, i32) {
    %c0_i32 = arith.constant 0 : i32
    %c0_i32_0 = arith.constant 0 : i32
    return %arg0, %c0_i32 : i32, i32
  }
  func.func @transform_1(%arg0: i32) -> (i32, i32) {
    %c0_i32 = arith.constant 0 : i32
    %c0_i32_0 = arith.constant 0 : i32
    return %arg0, %c0_i32 : i32, i32
  }
  func.func @transform_2(%arg0: i32) -> (i32, i32) {
    %c0_i32 = arith.constant 0 : i32
    %c0_i32_0 = arith.constant 0 : i32
    return %arg0, %c0_i32 : i32, i32
  }
  func.func @transform_3(%arg0: i32) -> (i32, i32) {
    %c0_i32 = arith.constant 0 : i32
    %c0_i32_0 = arith.constant 0 : i32
    return %arg0, %c0_i32 : i32, i32
  }
}

</mosaic_0001>

<bundles_post_ra>
// kernel: tpu_custom_call.1
= control target key start
LH: loop header
LB: loop body
LE: loop exit
PB: predicated region body
PF: predicated region fallthrough
CT: control target
= control target key end

     0   :  { %8 = vsyncpa [#allocation3], 0  ;;  %s288_s0 = inlined_call_operand.hbm [shape: f32[8,64], index: 0, kind: input, shape index: {}]   ;;  %s289_s1 = inlined_call_operand.hbm [shape: f32[8,64], index: 1, kind: input, shape index: {}]   ;;  %s290_s2 = inlined_call_operand.hbm [shape: f32[8,64], index: 2, kind: input, shape index: {}]   ;;  %s291_s3 = inlined_call_operand.hbm [shape: f32[1,8], index: 3, kind: output, shape index: {}]  }
   0x1   :  { %9 = vsyncpa [#allocation6], 0 }
   0x2   :  { %10 = vsyncpa [#allocation4], 0  ;;  %s214_s12 = smov [#allocation5]   ;;  %s215_s14 = smov [#allocation2]  }
   0x3   :  { %s27_s13 = sshll.u32 %s214_s12, 4  ;;  %s17_s15 = sshll.u32 %s215_s14, 4  ;;  %s28_s13 = int_to_ptr.vmem [resolvable:$true] %s27_s13  ;;  %s18_s15 = int_to_ptr.vmem [resolvable:$true] %s17_s15 }
   0x4   :  { %s120_s18 = scalar_lea.hbm %s289_s1, 128 }
   0x5   :  { %p121_p0 = scmp.ne.s32.totalorder %s289_s1, %s120_s18  ;;  %p124_p1 = scmp.lt.u32.totalorder %s120_s18, %s289_s1 }
   0x7   :  { %p126_p2 = pnand %p124_p1, %p121_p0 }
   0x9   :  { %129 = shalt.err (!%p126_p2)
}
   0xa   :  { %s130_s23 = scalar_lea.vmem %s28_s13, 128  ;;  %p135_p4 = scmp.lt.s32.totalorder %s28_s13, %s28_s13 }
   0xb   :  { %p131_p3 = scmp.ne.s32.totalorder %s28_s13, %s130_s23  ;;  %p136_p5 = scmp.lt.s32.totalorder %s130_s23, %s130_s23 }
   0xd   :  { %p137_p6 = por %p136_p5, %p135_p4 }
   0xf   :  { %p138_p7 = pnand %p137_p6, %p131_p3 }
  0x11   :  { %141 = shalt.err (!%p138_p7)
}
  0x12   :  { %30 = dma.hbm_to_vmem [thread:$0]  %s289_s1, 128, %s28_s13, [#allocation6]  }
  0x13   :  { %s142_s28 = scalar_lea.hbm %s288_s0, 128 }
  0x14   :  { %p143_p8 = scmp.ne.s32.totalorder %s288_s0, %s142_s28  ;;  %p146_p9 = scmp.lt.u32.totalorder %s142_s28, %s288_s0 }
  0x16   :  { %p148_p10 = pnand %p146_p9, %p143_p8 }
  0x18   :  { %151 = shalt.err (!%p148_p10)
}
  0x19   :  { %s152_s6 = scalar_lea.vmem %s18_s15, 128  ;;  %p157_p12 = scmp.lt.s32.totalorder %s18_s15, %s18_s15 }
  0x1a   :  { %p153_p11 = scmp.ne.s32.totalorder %s18_s15, %s152_s6  ;;  %p158_p13 = scmp.lt.s32.totalorder %s152_s6, %s152_s6 }
  0x1c   :  { %p159_p0 = por %p158_p13, %p157_p12 }
  0x1e   :  { %p160_p1 = pnand %p159_p0, %p153_p11 }
  0x20   :  { %163 = shalt.err (!%p160_p1)
}
  0x21   :  { %20 = dma.hbm_to_vmem [thread:$0]  %s288_s0, 128, %s18_s15, [#allocation3]  }
  0x22   :  { %s216_s8 = smov [#allocation7]   ;;  %s164_s12 = scalar_lea.hbm %s290_s2, 128 }
  0x23   :  { %s37_s9 = sshll.u32 %s216_s8, 4  ;;  %p165_p2 = scmp.ne.s32.totalorder %s290_s2, %s164_s12  ;;  %s38_s9 = int_to_ptr.vmem [resolvable:$true] %s37_s9 }
  0x24   :  { %p168_p3 = scmp.lt.u32.totalorder %s164_s12, %s290_s2 }
  0x26   :  { %p170_p4 = pnand %p168_p3, %p165_p2 }
  0x28   :  { %173 = shalt.err (!%p170_p4)
}
  0x29   :  { %s174_s18 = scalar_lea.vmem %s38_s9, 128  ;;  %p179_p6 = scmp.lt.s32.totalorder %s38_s9, %s38_s9 }
  0x2a   :  { %p175_p5 = scmp.ne.s32.totalorder %s38_s9, %s174_s18  ;;  %p180_p7 = scmp.lt.s32.totalorder %s174_s18, %s174_s18 }
  0x2c   :  { %p181_p8 = por %p180_p7, %p179_p6 }
  0x2e   :  { %p182_p9 = pnand %p181_p8, %p175_p5 }
  0x30   :  { %185 = shalt.err (!%p182_p9)
}
  0x31   :  { %40 = dma.hbm_to_vmem [thread:$0]  %s290_s2, 128, %s38_s9, [#allocation6]  }
  0x32   :  { %208 = dma.done.wait [#allocation3], 128  }
  0x33   :  { %209 = vsyncadd [#allocation3], 4294967168 }
  0x34   :  { %210 = dma.done.wait [#allocation6], 256  }
  0x35   :  { %211 = vsyncadd [#allocation6], 4294967040  ;;  %v52_v0 = vld [vmem:[#allocation7] sm:$0xff]  ;;  %s217_s19 = smov 32   ;;  %s218_s20 = smov 96   ;;  %v51_v1 = vld [vmem:[#allocation5] sm:$0xff]  ;;  %v89_v18 = vlaneseq }
  0x36   :  { %65 = vrot.lane.b32.xlu0 %v52_v0, %s217_s19  ;;  %v53_v2 = vmul.f32 %v52_v0, %v51_v1  ;;  %v50_v9 = vld [vmem:[#allocation2] sm:$0xff]  ;;  %vm84_vm0 = vcmask 261120   ;;  %s219_s2 = smov [#allocation8]   ;;  %vm96_vm1 = vcmask 57344  }
  0x37   :  { %v90_v19 = vand.u32 127, %v89_v18  ;;  %v92_v20 = vshrl.u32 %v89_v18, 7  ;;  %s104_s21 = sshll.u32 %s219_s2, 4  ;;  %s105_s21 = int_to_ptr.vmem [resolvable:$true] %s104_s21 }
  0x38   :  { %s186_s22 = scalar_lea.vmem %s105_s21, 16  ;;  %s190_s23 = scalar_lea.vmem %s105_s21, 32 }
  0x39   :  { %v93_v21 = vsub.s32 %v90_v19, %v92_v20  ;;  %p187_p10 = scmp.ne.s32.totalorder %s105_s21, %s186_s22  ;;  %p191_p11 = scmp.lt.s32.totalorder %s105_s21, %s105_s21 }
  0x3a   :  { %61 = vrot.lane.b32.xlu0 %v52_v0, %s218_s20  ;;  %p192_p12 = scmp.lt.s32.totalorder %s190_s23, %s186_s22 }
  0x3c   :  { %p193_p13 = por %p192_p12, %p191_p11 }
  0x3e   :  { %55 = vrot.lane.b32.xlu0 %v53_v2, %s218_s20  ;;  %p194_p0 = pnand %p193_p13, %p187_p10 }
  0xa8   :  { %v66_v3 = vpop.permute.xlu0 %65 }
  0xa9   :  { %v68_v4 = vmul.f32 %v66_v3, %v51_v1 }
  0xab   :  { %70 = vrot.lane.b32.xlu1 %v68_v4, %s218_s20 }
  0xac   :  { %v62_v5 = vpop.permute.xlu0 %61 }
  0xad   :  { %v64_v6 = vmul.f32 %v62_v5, %v51_v1 }
  0xb0   :  { %v56_v12 = vpop.permute.xlu0 %55 }
  0xb1   :  { %v58_v13 = vadd.f32 %v56_v12, %v53_v2 }
  0xb3   :  { %v59_v14 = vmul.f32 %v58_v13, %v50_v9 }
 0x11d   :  { %v71_v7 = vpop.permute.xlu1 %70 }
 0x11e   :  { %v73_v8 = vsub.f32 %v64_v6, %v71_v7 }
 0x120   :  { %75 = vrot.lane.b32.xlu1 %v73_v8, %s217_s19 }
 0x192   :  { %v76_v10 = vpop.permute.xlu1 %75 }
 0x193   :  { %v78_v11 = vmul.f32 %v76_v10, %v50_v9 }
 0x195   :  { %80 = vrot.lane.b32.xlu1 %v78_v11, %s218_s20 }
 0x207   :  { %v81_v15 = vpop.permute.xlu1 %80 }
 0x208   :  { %v83_v16 = vadd.f32 %v81_v15, %v59_v14 }
 0x20a   :  { %v85_v17 = vsel %vm84_vm0, %v83_v16, 0.0 }
 0x20b   :  { %86 = vadd.xlane.f32.xlu0 %v85_v17 }
 0x298   :  { %v87_v22 = vpop.xlane.xlu0 %86 }
 0x299   :  { %v94_v23 = vrot.slane %v87_v22, %v93_v21 }
 0x29b   :  { %97 = vst.msk [vmem:[#allocation8] sm:$0x1] %vm96_vm1, %v94_v23 }
 0x29c   :  { %197 = shalt.err (!%p194_p0)
}
 0x29d   :  { %s198_s26 = scalar_lea.hbm %s291_s3, 16 }
 0x29e   :  { %p199_p1 = scmp.ne.s32.totalorder %s291_s3, %s198_s26  ;;  %p202_p2 = scmp.lt.u32.totalorder %s198_s26, %s291_s3 }
 0x2a0   :  { %p204_p3 = pnand %p202_p2, %p199_p1 }
 0x2a2   :  { %207 = shalt.err (!%p204_p3)
}
 0x2a3   :  { %107 = dma.vmem_to_hbm [thread:$0]  %s105_s21, 16, %s291_s3, [#allocation4]  }
 0x2a4   :  { %212 = dma.done.wait [#allocation4], 16  }
 0x2a5   :  { %213 = vsyncadd [#allocation4], 4294967280 }
 0x2a6   :  { %111 = vsyncpa [#allocation3], 1 }
 0x2a7   :  { %112 = vsyncpa [#allocation6], 1 }
 0x2a8   :  { %113 = vsyncpa [#allocation4], 1 }

</bundles_post_ra>
